<compile_context>
chip_gen: v7x
topology: tpu7x:2x2x1
jax: 0.10.0
libtpu: 0.0.40
codegen_flags: <defaults>
</compile_context>

<pallas_src>
import functools

import jax
import jax.numpy as jnp
from jax import lax
from jax.experimental import pallas as pl
from jax.experimental.pallas import tpu as pltpu

BN_EPS = 1e-5


# ----------------------------------------------------------------------------
# Tiling / VMEM helpers.
# ----------------------------------------------------------------------------
def _pick_rows(total, cap_rows):
    """Row tile: full extent if it fits, else the largest multiple of 8 <= cap.
    Non-dividing totals use a cdiv grid + in-kernel masking (no full-extent
    fallback that could blow VMEM on v7x)."""
    cap = max(8, (int(cap_rows) // 8) * 8)
    return total if total <= cap else cap


def _pick_lanes(total, cap_cols):
    """Lane tile: full extent if it fits, else the largest multiple of 128 <=
    cap (lane-dense stores); the ragged tail block is clipped by Pallas."""
    cap = max(128, (int(cap_cols) // 128) * 128)
    return total if total <= cap else cap


def _vmem_limit(block_bytes, *, margin=2 << 20, floor=4 << 20, ceiling=48 << 20):
    """Scoped-VMEM request: (already buffer-multiplied) need * 2 + margin,
    clamped to <= 48 MiB so v7x's 64 MiB per-TC VMEM keeps headroom."""
    need = int(sum(block_bytes))
    return int(min(max(2 * need + margin, floor), ceiling))


def _conv_x_spec(tl, C, *, triple_buffer):
    """Activation BlockSpec for pass 2; deepen pipelining to 3 buffers when the
    tile is small enough that the extra buffer is cheap even on v7x."""
    idx = lambda n, l: (n, l, 0)
    if triple_buffer and hasattr(pl, "Buffered"):
        try:
            return pl.BlockSpec((None, tl, C), idx, pipeline_mode=pl.Buffered(3))
        except TypeError:  # pipeline_mode not supported on this jax version
            pass
    return pl.BlockSpec((None, tl, C), idx)


# ----------------------------------------------------------------------------
# Pass 1: per-channel batch statistics (single sweep over x).
# ----------------------------------------------------------------------------
def _stats_kernel(x_ref, sum_ref, sumsq_ref, *, total_rows, tile_rows,
                  steps_per_chunk, ragged):
    """Accumulate per-lane sum(x) / sum(x*x) over (tile_rows, lanes) blocks.

    grid = (n_chunks, steps_per_chunk): the chunk axis is "parallel" (each
    chunk owns its own (8, lanes) partial accumulators -> v7x megacore split),
    the step axis is the serial reduction.  jnp.sum keeps the accumulation in
    exact f32 on the VPU/XLU (no MXU default-precision truncation).
    """
    step = pl.program_id(1)

    @pl.when(step == 0)
    def _init():
        sum_ref[...] = jnp.zeros_like(sum_ref)
        sumsq_ref[...] = jnp.zeros_like(sumsq_ref)

    x = x_ref[...].astype(jnp.float32)                  # (tile_rows, lanes)
    if ragged:
        # Mask rows past the true end (only the final block is ragged).
        start = (pl.program_id(0) * steps_per_chunk + step) * tile_rows
        row = lax.broadcasted_iota(jnp.int32, x.shape, 0) + start
        x = jnp.where(row < total_rows, x, 0.0)

    sum_ref[0:1, :] += jnp.sum(x, axis=0, keepdims=True)
    sumsq_ref[0:1, :] += jnp.sum(x * x, axis=0, keepdims=True)


# ----------------------------------------------------------------------------
# Pass 2: BN folded into the 1x1 conv, computed on the MXU.
# ----------------------------------------------------------------------------
def _bn_conv_kernel(x_ref, w_ref, b_ref, o_ref):
    """o[f, l] = sum_c w_fold[f, c] * x[l, c] + b_fold[f].

    x_ref: (tl, C)  w_ref: (F, C)  b_ref: (F, 1)  o_ref: (F, tl).
    Contraction on the trailing dim of both operands lowers to the MXU's
    native transposed-RHS path (like q @ k.T), so the big activation tile is
    never transposed and L stays lane-dense in the output store.
    """
    out = lax.dot_general(
        w_ref[...], x_ref[...].astype(jnp.float32),
        dimension_numbers=(((1,), (1,)), ((), ())),
        preferred_element_type=jnp.float32,
        precision=lax.Precision.HIGHEST)
    o_ref[...] = (out + b_ref[...]).astype(o_ref.dtype)


# ----------------------------------------------------------------------------
# Wrapper.
# ----------------------------------------------------------------------------
def middle_forward(x, gamma, beta, conv_w, conv_b, *,
                   row_tile=None, l_tile=None,
                   stats_block_bytes=8 << 20, conv_block_bytes=2 << 20):
    """x: (N, L, C) float32.  Returns (N, feature_dim, L) like the PyTorch module."""
    assert x.ndim == 3
    N, L, C = x.shape
    F = conv_w.shape[0]                       # conv_w: (F, C, 1) PyTorch layout
    M = N * L
    fdt = jnp.float32
    esize = jnp.dtype(x.dtype).itemsize

    # ---- Pass 1: global batch statistics (one sweep over x). ----------------
    # Lane-dense view: fold 128 // C consecutive rows into one 128-lane row so
    # every vreg / accumulator lane is live (C=32 -> only 32/128 otherwise).
    if C <= 128 and 128 % C == 0 and M % (128 // C) == 0:
        group, lanes = 128 // C, 128
    else:
        group, lanes = 1, C
    rows = M // group
    x2d = x.reshape(rows, lanes)              # contiguous reshape: free

    if row_tile is None:
        row_tile = stats_block_bytes // (lanes * esize)
    tm = _pick_rows(rows, row_tile)
    total_steps = pl.cdiv(rows, tm)
    n_chunks = 2 if (total_steps >= 2 and total_steps % 2 == 0) else 1
    steps_per_chunk = total_steps // n_chunks
    ragged = (rows % tm) != 0

    stats_kernel = functools.partial(
        _stats_kernel, total_rows=rows, tile_rows=tm,
        steps_per_chunk=steps_per_chunk, ragged=ragged)

    part_sum, part_sumsq = pl.pallas_call(
        stats_kernel,
        out_shape=(jax.ShapeDtypeStruct((n_chunks * 8, lanes), fdt),
                   jax.ShapeDtypeStruct((n_chunks * 8, lanes), fdt)),
        grid=(n_chunks, steps_per_chunk),
        in_specs=[pl.BlockSpec(
            (tm, lanes), lambda c, s, spc=steps_per_chunk: (c * spc + s, 0))],
        out_specs=[pl.BlockSpec((8, lanes), lambda c, s: (c, 0)),
                   pl.BlockSpec((8, lanes), lambda c, s: (c, 0))],
        compiler_params=pltpu.CompilerParams(
            dimension_semantics=("parallel", "arbitrary"),
            vmem_limit_bytes=_vmem_limit(
                [2 * tm * lanes * esize, 2 * 2 * 8 * lanes * 4])),
        cost_estimate=pl.CostEstimate(
            flops=3 * M * C, transcendentals=0,
            bytes_accessed=esize * M * C + 2 * 4 * n_chunks * 8 * lanes),
    )(x2d)

    sums = jnp.sum(part_sum, axis=0)          # (lanes,); rows 1..7 are zeros
    sumsqs = jnp.sum(part_sumsq, axis=0)
    if group > 1:
        sums = sums.reshape(group, C).sum(axis=0)
        sumsqs = sumsqs.reshape(group, C).sum(axis=0)

    # ---- Fold BatchNorm (training-mode biased stats) into the 1x1 conv. -----
    #   y = scale*(x - mean) + beta ;  out = W @ y + b
    #     = (W*scale) @ x + (W @ (beta - scale*mean) + b)
    # NOTE: single-pass variance (E[x^2]-E[x]^2) can lose precision when
    # |mean| >> std at very large M; accepted here to keep one sweep over x.
    mean = sums / M
    var = jnp.maximum(sumsqs / M - mean * mean, 0.0)
    scale = gamma.astype(fdt) * lax.rsqrt(var + BN_EPS)        # (C,)
    w_fc = conv_w[:, :, 0].astype(fdt)                         # (F, C)
    w_fold = w_fc * scale[None, :]                             # (F, C)
    b_fold = (conv_b.astype(fdt)
              + w_fc @ (beta.astype(fdt) - mean * scale)).reshape(F, 1)

    # ---- Pass 2: tiled 1x1 conv on the MXU, writing (N, F, L) directly. -----
    if l_tile is None:
        l_tile = conv_block_bytes // (C * esize)
    tl = _pick_lanes(L, l_tile)
    grid_l = pl.cdiv(L, tl)          # ragged tail: OOB output lanes are clipped

    x_tile_bytes = tl * C * esize
    triple = x_tile_bytes <= (4 << 20) and hasattr(pl, "Buffered")
    x_bufs = 3 if triple else 2

    out = pl.pallas_call(
        _bn_conv_kernel,
        out_shape=jax.ShapeDtypeStruct((N, F, L), x.dtype),
        grid=(N, grid_l),
        in_specs=[
            _conv_x_spec(tl, C, triple_buffer=triple),        # activation tile
            pl.BlockSpec((F, C), lambda n, l: (0, 0)),        # folded weight
            pl.BlockSpec((F, 1), lambda n, l: (0, 0)),        # folded bias
        ],
        out_specs=pl.BlockSpec((None, F, tl), lambda n, l: (n, 0, l)),
        compiler_params=pltpu.CompilerParams(
            dimension_semantics=("parallel", "parallel"),     # megacore split
            vmem_limit_bytes=_vmem_limit(
                [x_bufs * x_tile_bytes, 2 * F * tl * esize,
                 2 * F * C * 4, 2 * F * 4])),
        cost_estimate=pl.CostEstimate(
            flops=2 * M * C * F, transcendentals=0,
            bytes_accessed=esize * (M * C + M * F) + 4 * (F * C + F)),
    )(x, w_fold, b_fold)
    return out


def middle_reference(x, gamma, beta, conv_w, conv_b):
    # Pure-JAX reference of the same semantics (PyTorch training-mode BN).
    xt = jnp.transpose(x, (0, 2, 1))                       # (N, C, L)
    mean = jnp.mean(xt, axis=(0, 2), keepdims=True)
    var = jnp.mean((xt - mean) ** 2, axis=(0, 2), keepdims=True)
    xhat = (xt - mean) / jnp.sqrt(var + BN_EPS)
    y = xhat * gamma[None, :, None] + beta[None, :, None]
    out = jnp.einsum('ncl,fc->nfl', y, conv_w[:, :, 0],
                     precision=lax.Precision.HIGHEST) + conv_b[None, :, None]
    return out


if __name__ == "__main__":
    # Small shapes consistent with the module: N=2, L=200, d_model=32, F=16.
    # L=200 exercises the ragged (masked / clipped) tail blocks in both passes
    # and the 2-chunk parallel stats split; row_tile / l_tile are forced small
    # so the toy problem still runs multi-step pipelined grids.
    N, L, D_MODEL, FEATURE_DIM = 2, 200, 32, 16

    key = jax.random.PRNGKey(0)
    kx, kw, kb, kg, kbt = jax.random.split(key, 5)

    x = jax.random.normal(kx, (N, L, D_MODEL), dtype=jnp.float32)

    # Non-trivial BN affine params to exercise the weight fold.
    gamma = 1.0 + 0.1 * jax.random.normal(kg, (D_MODEL,), dtype=jnp.float32)
    beta = 0.1 * jax.random.normal(kbt, (D_MODEL,), dtype=jnp.float32)

    # Conv1d(d_model, feature_dim, k=1): weight (F, C, 1), bias (F,).
    bound = 1.0 / (D_MODEL ** 0.5)
    conv_w = jax.random.uniform(kw, (FEATURE_DIM, D_MODEL, 1),
                                minval=-bound, maxval=bound, dtype=jnp.float32)
    conv_b = jax.random.uniform(kb, (FEATURE_DIM,),
                                minval=-bound, maxval=bound, dtype=jnp.float32)

    out = middle_forward(x, gamma, beta, conv_w, conv_b, row_tile=32, l_tile=128)
    out = jax.block_until_ready(out)

    ref = middle_reference(x, gamma, beta, conv_w, conv_b)
    assert out.shape == (N, FEATURE_DIM, L), out.shape
    max_err = float(jnp.max(jnp.abs(out - ref)))
    assert jnp.allclose(out, ref, atol=1e-4, rtol=1e-4), max_err

    print("KERNEL_OK")
</pallas_src>

<mosaic_0001>
module attributes {stable_mosaic.version = 11 : i64} {
  func.func @_stats_kernel(%arg0: i32, %arg1: i32, %arg2: memref<32x128xf32, #tpu.memory_space<vmem>>, %arg3: memref<8x128xf32, #tpu.memory_space<vmem>>, %arg4: memref<8x128xf32, #tpu.memory_space<vmem>>) attributes {dimension_semantics = [#tpu.dimension_semantics<parallel>, #tpu.dimension_semantics<arbitrary>], iteration_bounds = array<i64: 2, 2>, scalar_prefetch = 0 : i64, scratch_operands = 0 : i64, tpu.core_type = #tpu.core_type<tc>, window_params = [{transform_indices = @transform_0, window_bounds = array<i64: 32, 128>}, {transform_indices = @transform_1, window_bounds = array<i64: 8, 128>}, {transform_indices = @transform_2, window_bounds = array<i64: 8, 128>}]} {
    %c0_i32 = arith.constant 0 : i32
    %0 = arith.cmpi eq, %arg1, %c0_i32 : i32
    %1 = arith.extui %0 : i1 to i32
    %c0_i32_0 = arith.constant 0 : i32
    %2 = arith.cmpi ne, %1, %c0_i32_0 : i32
    scf.if %2 {
      %cst_12 = arith.constant 0.000000e+00 : f32
      %25 = vector.broadcast %cst_12 : f32 to vector<8x128xf32>
      %c0_13 = arith.constant 0 : index
      %c0_14 = arith.constant 0 : index
      %26 = vector.load %arg3[%c0_13, %c0_14] : memref<8x128xf32, #tpu.memory_space<vmem>>, vector<8x128xf32>
      tpu.vector_store %arg3[%c0_13, %c0_14], %25 {strides = array<i32>} : memref<8x128xf32, #tpu.memory_space<vmem>>, vector<8x128xf32>,
      %cst_15 = arith.constant 0.000000e+00 : f32
      %27 = vector.broadcast %cst_15 : f32 to vector<8x128xf32>
      %c0_16 = arith.constant 0 : index
      %c0_17 = arith.constant 0 : index
      %28 = vector.load %arg4[%c0_16, %c0_17] : memref<8x128xf32, #tpu.memory_space<vmem>>, vector<8x128xf32>
      tpu.vector_store %arg4[%c0_16, %c0_17], %27 {strides = array<i32>} : memref<8x128xf32, #tpu.memory_space<vmem>>, vector<8x128xf32>,
    } else {
    }
    %c0 = arith.constant 0 : index
    %c0_1 = arith.constant 0 : index
    %3 = vector.load %arg2[%c0, %c0_1] : memref<32x128xf32, #tpu.memory_space<vmem>>, vector<32x128xf32>
    %c2_i32 = arith.constant 2 : i32
    %4 = arith.muli %arg0, %c2_i32 : i32
    %5 = arith.addi %4, %arg1 : i32
    %c32_i32 = arith.constant 32 : i32
    %6 = arith.muli %5, %c32_i32 : i32
    %7 = tpu.iota {dimensions = array<i32: 0>} : vector<32x128xi32>
    %8 = vector.broadcast %6 : i32 to vector<32x128xi32>
    %9 = arith.addi %7, %8 : vector<32x128xi32>
    %c100_i32 = arith.constant 100 : i32
    %10 = vector.broadcast %c100_i32 : i32 to vector<32x128xi32>
    %11 = arith.cmpi slt, %9, %10 : vector<32x128xi32>
    %cst = arith.constant 0.000000e+00 : f32
    %12 = vector.broadcast %cst : f32 to vector<32x128xf32>
    %13 = arith.select %11, %3, %12 : vector<32x128xi1>, vector<32x128xf32>
    %c0_2 = arith.constant 0 : index
    %c0_3 = arith.constant 0 : index
    %14 = vector.load %arg3[%c0_2, %c0_3] : memref<8x128xf32, #tpu.memory_space<vmem>>, vector<1x128xf32>
    %cst_4 = arith.constant dense<0.000000e+00> : vector<128xf32>
    %15 = vector.multi_reduction <add>, %13, %cst_4 [0] : vector<32x128xf32> to vector<128xf32>
    %16 = vector.shape_cast %15 : vector<128xf32> to vector<1x128xf32>
    %17 = arith.addf %14, %16 : vector<1x128xf32>
    %c0_5 = arith.constant 0 : index
    %c0_6 = arith.constant 0 : index
    %18 = vector.load %arg3[%c0_5, %c0_6] : memref<8x128xf32, #tpu.memory_space<vmem>>, vector<1x128xf32>
    tpu.vector_store %arg3[%c0_5, %c0_6], %17 {strides = array<i32>} : memref<8x128xf32, #tpu.memory_space<vmem>>, vector<1x128xf32>,
    %c0_7 = arith.constant 0 : index
    %c0_8 = arith.constant 0 : index
    %19 = vector.load %arg4[%c0_7, %c0_8] : memref<8x128xf32, #tpu.memory_space<vmem>>, vector<1x128xf32>
    %20 = arith.mulf %13, %13 : vector<32x128xf32>
    %cst_9 = arith.constant dense<0.000000e+00> : vector<128xf32>
    %21 = vector.multi_reduction <add>, %20, %cst_9 [0] : vector<32x128xf32> to vector<128xf32>
    %22 = vector.shape_cast %21 : vector<128xf32> to vector<1x128xf32>
    %23 = arith.addf %19, %22 : vector<1x128xf32>
    %c0_10 = arith.constant 0 : index
    %c0_11 = arith.constant 0 : index
    %24 = vector.load %arg4[%c0_10, %c0_11] : memref<8x128xf32, #tpu.memory_space<vmem>>, vector<1x128xf32>
    tpu.vector_store %arg4[%c0_10, %c0_11], %23 {strides = array<i32>} : memref<8x128xf32, #tpu.memory_space<vmem>>, vector<1x128xf32>,
    return
  }
  func.func @transform_0(%arg0: i32, %arg1: i32) -> (i32, i32) {
    %c2_i32 = arith.constant 2 : i32
    %0 = arith.muli %arg0, %c2_i32 : i32
    %1 = arith.addi %0, %arg1 : i32
    %c0_i32 = arith.constant 0 : i32
    %c0_i32_0 = arith.constant 0 : i32
    return %1, %c0_i32 : i32, i32
  }
  func.func @transform_1(%arg0: i32, %arg1: i32) -> (i32, i32) {
    %c0_i32 = arith.constant 0 : i32
    %c0_i32_0 = arith.constant 0 : i32
    return %arg0, %c0_i32 : i32, i32
  }
  func.func @transform_2(%arg0: i32, %arg1: i32) -> (i32, i32) {
    %c0_i32 = arith.constant 0 : i32
    %c0_i32_0 = arith.constant 0 : i32
    return %arg0, %c0_i32 : i32, i32
  }
}

</mosaic_0001>

<bundles_post_ra>
// kernel: tpu_custom_call.1
= control target key start
LH: loop header
LB: loop body
LE: loop exit
PB: predicated region body
PF: predicated region fallthrough
CT: control target
= control target key end

     0   :  { %8 = vsyncpa [#allocation3], 0  ;;  %s1019_s0 = inlined_call_operand.hbm [shape: f32[100,128], index: 0, kind: input, shape index: {}]   ;;  %s1020_s1 = inlined_call_operand.hbm [shape: f32[16,128], index: 1, kind: output, shape index: {0}]   ;;  %s1021_s2 = inlined_call_operand.hbm [shape: f32[16,128], index: 2, kind: output, shape index: {1}]  }
   0x1   :  { %10 = vsyncpa [#allocation3 + $0x1], 0 }
   0x2   :  { %11 = vsyncpa [#allocation4], 0 }
   0x3   :  { %13 = vsyncpa [#allocation4 + $0x1], 0 }
   0x4   :  { %14 = vsyncpa [#allocation7], 0 }
   0x5   :  { %16 = vsyncpa [#allocation7 + $0x1], 0  ;;  %s747_s9 = smov 0   ;;  %s749_s10 = smov 0  }
   0x6   :  { %s751_s11 = smov 0   ;;  %s753_s12 = smov 0  }
   0x7   :  { %s755_s13 = smov 0   ;;  %s757_s14 = smov 0  }
   0x8   :  { %s759_s15 = smov 0   ;;  %s761_s16 = smov 0  }
   0x9   :  { %s763_s17 = smov 0   ;;  %s765_s18 = smov 0  }
   0xa   :  { %s767_s19 = smov 0  }
   0xb LB: > { %s410_s20 = sadd.s32 4294967295, %s724_s19   ;;  %s411_s21 = sadd.s32 4294967294, %s724_s19   ;;  %s724_s19 = sphi %s767_s19, %s22_s19   ;;  %s720_s18 = sphi %s765_s18, %s1042_s18   ;;  %s716_s17 = sphi %s763_s17, %s1041_s17   ;;  %s712_s16 = sphi %s761_s16, %s1040_s16   ;;  %s708_s15 = sphi %s759_s15, %s1039_s15   ;;  %s704_s14 = sphi %s757_s14, %s1038_s14   ;;  %s700_s13 = sphi %s755_s13, %s1037_s13   ;;  %s696_s12 = sphi %s753_s12, %s1036_s12   ;;  %s692_s11 = sphi %s751_s11, %s1035_s11   ;;  %s688_s10 = sphi %s749_s10, %s1034_s10   ;;  %s684_s9 = sphi %s747_s9, %s1033_s9  }
   0xc   : > { %s31_s22 = sadd.s32 1, %s716_s17  ;;  %s34_s23 = sadd.s32 1, %s720_s18 }
   0xd   : > { %p32_p0 = scmp.ge.s32.totalorder %s31_s22, 2  ;;  %s412_s24 = sshll.u32 %s720_s18, 1 }
   0xe   : > { %s806_s25 = sadd.s32 %s716_s17, %s412_s24  ;;  %s45_s26 = sadd.s32 1, %s704_s14 }
   0xf   : > { %s1044_s22 = smov (%p32_p0, %s31_s22), 0  ;;  %s1046_s23 = smov (!%p32_p0, %s34_s23), %s720_s18 }
  0x10   : > { %1024 = sst [smem:[#allocation11_spill]] %s1044_s22  ;;  %p52_p1 = scmp.ne.s32.totalorder %s704_s14, %s700_s13 }
  0x11   : > { %p53_p2 = scmp.eq.s32.totalorder %s724_s19, 0  ;;  %p36_p3 = scmp.ge.s32.totalorder %s1046_s23, 2 }
  0x12   : > { %p58_p4 = scmp.ne.s32.totalorder %s700_s13, %s696_s12  ;;  %p59_p6 = scmp.eq.s32.totalorder %s410_s20, 0 }
  0x13   : > { %p816_p5 = por %p53_p2, %p52_p1  ;;  %s1048_s23 = smov (%p36_p3, %s1046_s23), 0 }
  0x14   : > { %1026 = sst [smem:[#allocation12_spill]] %s1048_s23  ;;  %p822_p7 = por %p59_p6, %p58_p4 }
  0x15   : > { %s71_s29 = sadd.s32 1, %s692_s11  ;;  %s413_s30 = sshll.u32 %s1048_s23, 1 }
  0x16   : > { %s68_s3 = ssub.s32 %s720_s18, %s1048_s23  ;;  %s41_s4 = sadd.s32 %s413_s30, %s1044_s22 }
  0x17   : > { %p69_p8 = scmp.eq.s32.totalorder %s68_s3, 0  ;;  %s42_s5 = ssub.s32 %s806_s25, %s41_s4 }
  0x18   : > { %p81_p9 = scmp.ne.s32.totalorder %s692_s11, %s688_s10  ;;  %p43_p10 = scmp.eq.s32.totalorder %s42_s5, 0 }
  0x19   : > { %p82_p11 = scmp.eq.s32.totalorder %s410_s20, 3  ;;  %p87_p13 = scmp.ne.s32.totalorder %s688_s10, %s684_s9 }
  0x1a   : > { %s835_s6 = scalar_select %p69_p8, %s692_s11, %s71_s29  }
  0x1b   : > { %s838_s7 = scalar_select %p43_p10, %s704_s14, %s45_s26  }
  0x1c   : > { %p840_p12 = por %p82_p11, %p81_p9  ;;  %p88_p0 = scmp.eq.s32.totalorder %s411_s21, 3 }
  0x1d   : > { %p415_p2 = scmp.ge.s32.totalorder %s724_s19, 4 }
  0x1e   : > { %p848_p1 = por %p88_p0, %p87_p13 }
  0x1f   : > { %130 = sbr.rel (%p415_p2) target bundleno = 73 (0x49), region = 16 }
  0x20   : > { %s1029_s12 = scalar_select %p848_p1, 1, 0 }
  0x26   : > { %133 = sbr.rel (!%p816_p5) target bundleno = 73 (0x49), region = 20  ;;  %s134_s20 = sand.u32 (%p816_p5), 1, %s704_s14  }
  0x27   : > { %s418_s24 = sshll.u32 (%p816_p5), %s806_s25, 2  ;;  %s416_s26 = sshll.u32 (%p816_p5), %s134_s20, 5 }
  0x28   : > { %s142_s29 = ssub.s32 (%p816_p5), 13, %s418_s24  ;;  %s860_s3 = scalar_lea.sflag (%p816_p5), [#allocation3], %s134_s20 }
  0x29   : > { %p143_p3 = scmp.lt.s32.totalorder (%p816_p5), %s142_s29, 4  ;;  %s138_s4 = scalar_lea.vmem (%p816_p5), [#allocation2], %s416_s26 }
  0x2d   : > { %s1050_s29 = smov (!%p143_p3, %s142_s29), 4 }
  0x2e   : > { %s857_s30 = sshll.u32 %s1050_s29, 7 }
  0x2f   : > { %s147_s21 = ssub.s32 512, %s857_s30 }
  0x30   : > { %148 = vsyncadd %s860_s3, %s147_s21  ;;  %p420_p4 = scmp.ne.s32.totalorder %s857_s30, 0  ;;  %s437_s27 = sshll.u32 %s806_s25, 9 }
  0x31   : > { %s868_s24 = scalar_lea.hbm %s1019_s0, %s437_s27  ;;  %s153_s20 = sshll.u32 %s138_s4, 4  ;;  %s870_s20 = int_to_ptr.vmem [resolvable:$true] %s153_s20 }
  0x32   : > { %s542_s26 = scalar_lea.hbm %s868_s24, %s857_s30  ;;  %s546_s25 = scalar_lea.hbm %s1019_s0, 1664 }
  0x33   : > { %p543_p5 = scmp.ne.s32.totalorder %s868_s24, %s542_s26  ;;  %p547_p9 = scmp.lt.u32.totalorder %s868_s24, %s1019_s0 }
  0x34   : > { %p548_p10 = scmp.lt.u32.totalorder %s546_s25, %s542_s26  ;;  %p550_p13 = scmp.lt.u32.totalorder %s542_s26, %s868_s24 }
  0x35   : > { %p544_p6 = pnand %p543_p5, %p420_p4 }
  0x36   : > { %p549_p11 = por %p548_p10, %p547_p9 }
  0x37   : > { %p545_p8 = pneg %p544_p6 }
  0x38   : > { %p551_p0 = por %p550_p13, %p549_p11 }
  0x3a   : > { %p552_p2 = pnand %p551_p0, %p545_p8 }
  0x3c   : > { %555 = shalt.err (!%p552_p2)
}
  0x3d   : > { %s556_s4 = scalar_lea.vmem %s870_s20, %s857_s30  ;;  %s726_s27 = smov [#allocation2]  }
  0x3e   : > { %p557_p3 = scmp.ne.s32.totalorder %s870_s20, %s556_s4  ;;  %s560_s5 = sshll.u32 %s726_s27, 4  ;;  %s561_s5 = int_to_ptr.vmem [resolvable:$false] %s560_s5 }
  0x3f   : > { %s562_s22 = scalar_lea.vmem %s561_s5, 1024  ;;  %p563_p1 = scmp.lt.s32.totalorder %s870_s20, %s561_s5 }
  0x40   : > { %p558_p5 = pnand %p557_p3, %p420_p4  ;;  %p564_p9 = scmp.lt.s32.totalorder %s562_s22, %s556_s4 }
  0x42   : > { %p559_p6 = pneg %p558_p5  ;;  %p565_p10 = por %p564_p9, %p563_p1 }
  0x44   : > { %p566_p11 = pnand %p565_p10, %p559_p6 }
  0x46   : > { %569 = shalt.err (!%p566_p11)
}
  0x47   : > { %s727_s26 = smov 128   ;;  %s728_s29 = smov 8  }
  0x48   : > { %159 = dma.hbm_to_vmem [thread:$0]  (%p420_p4), %s868_s24, %s857_s30, %s870_s20, %s860_s3, %s727_s26, %s727_s26, %s728_s29  }
  0x49 PF: > { %p424_p8 = scmp.ge.s32.totalorder %s724_s19, 1  ;;  %p161_p13 = scmp.lt.s32.totalorder %s724_s19, 5 }
  0x4b   : > { %p162_p0 = pnand %p424_p8, %p161_p13 }
  0x4c   : > { %s167_s21 = sand.u32 (!%p162_p0), 1, %s700_s13  }
  0x4d   : > { %165 = sbr.rel (%p162_p0) target bundleno = 162 (0xa2), region = 24  ;;  %s425_s25 = sshll.u32 (!%p162_p0), %s167_s21, 5 }
  0x4e   : > { %s168_s23 = scalar_lea.sflag (!%p162_p0), [#allocation3], %s167_s21  ;;  %s171_s4 = scalar_lea.vmem (!%p162_p0), [#allocation2], %s425_s25 }
  0x54   : > { %671 = dma.done.wait (%p822_p7), %s168_s23, 512  }
  0x55   : > { %673 = vsyncadd (%p822_p7), %s168_s23, 4294966784  ;;  %s905_s30 = sand.u32 1, %s688_s10   ;;  %p428_p1 = scmp.ne.s32.totalorder %s708_s15, 0 }
  0x56   : > { %s426_s3 = sshll.u32 %s905_s30, 3  ;;  %v729_v0 = vmov (!%p428_p1), 0.0  }
  0x57   : > { %s908_s24 = scalar_lea.vmem [#allocation5], %s426_s3  ;;  %s910_s20 = scalar_lea.vmem [#allocation6], %s426_s3 }
  0x58   : > { %207 = sbr.rel (%p428_p1) target bundleno = 95 (0x5f), region = 32  ;;  %208 = vst [vmem:[%s908_s24] sm:$0xff] (!%p428_p1), %v729_v0  ;;  %209 = vst [vmem:[%s910_s20] sm:$0xff] (!%p428_p1), %v729_v0 }
  0x5f PF: > { %s429_s28 = sshll.u32 %s712_s16, 1  ;;  %v217_v1 = vlaneseq  ;;  %v210_v4 = vld [vmem:[%s171_s4] sm:$0xff]  ;;  %v211_v9 = vld [vmem:[%s171_s4 + $0x8] sm:$0xff]  ;;  %v212_v10 = vld [vmem:[%s171_s4 + $0x10] sm:$0xff]  ;;  %s282_s22 = sshll.u32 %s908_s24, 4  ;;  %s927_s22 = int_to_ptr.vmem [resolvable:$true] %s282_s22 }
  0x60   : > { %s215_s27 = sadd.s32 %s708_s15, %s429_s28  ;;  %v213_v11 = vld [vmem:[%s171_s4 + $0x18] sm:$0xff]  ;;  %v235_v38 = vld [vmem:[%s908_s24] sm:$0x1]  ;;  %s433_s15 = sshll.u32 %s712_s16, 7 }
  0x61   : > { %s430_s5 = sshll.u32 %s215_s27, 5  ;;  %v218_v2 = vshrl.u32 %v217_v1, 7  ;;  %v247_v41 = vld [vmem:[%s910_s20] sm:$0x1]  ;;  %s295_s26 = sshll.u32 %s910_s20, 4  ;;  %s935_s26 = int_to_ptr.vmem [resolvable:$true] %s295_s26 }
  0x62   : > { %v222_v3 = vstv %s430_s5  ;;  %s925_s25 = scalar_lea.hbm %s1020_s1, %s433_s15  ;;  %s933_s4 = scalar_lea.hbm %s1021_s2, %s433_s15 }
  0x63   : > { %v219_v5 = vadd.s32 8, %v218_v2  ;;  %v220_v6 = vadd.s32 16, %v218_v2  ;;  %v221_v7 = vadd.s32 24, %v218_v2  ;;  %v223_v8 = vadd.s32 %v222_v3, %v218_v2  ;;  %s264_s3 = scalar_lea.sflag [#allocation4], %s905_s30  ;;  %s570_s28 = scalar_lea.vmem %s927_s22, 128 }
  0x64   : > { %p571_p7 = scmp.ne.s32.totalorder %s927_s22, %s570_s28  ;;  %s730_s27 = smov [#allocation5]  }
  0x65   : > { %v224_v12 = vadd.s32 %v222_v3, %v219_v5  ;;  %v225_v13 = vadd.s32 %v222_v3, %v220_v6  ;;  %v226_v14 = vadd.s32 %v222_v3, %v221_v7  ;;  %vm227_vm0 = vcmp.lt.s32.totalorder %v223_v8, 100  ;;  %s574_s5 = sshll.u32 %s730_s27, 4  ;;  %s575_s5 = int_to_ptr.vmem [resolvable:$false] %s574_s5 }
  0x66   : > { %v231_v15 = vsel %vm227_vm0, %v210_v4, 0.0  ;;  %p572_p4 = pnand %p571_p7, %p840_p12  ;;  %s576_s29 = scalar_lea.vmem %s575_s5, 256 }
  0x67   : > { %vm228_vm1 = vcmp.lt.s32.totalorder %v224_v12, 100  ;;  %vm229_vm2 = vcmp.lt.s32.totalorder %v225_v13, 100  ;;  %vm230_vm3 = vcmp.lt.s32.totalorder %v226_v14, 100  ;;  %v248_v16 = vmul.f32 %v231_v15, %v231_v15  ;;  %p577_p3 = scmp.lt.s32.totalorder %s927_s22, %s575_s5  ;;  %p578_p5 = scmp.lt.s32.totalorder %s576_s29, %s570_s28 }
  0x68   : > { %v232_v17 = vsel %vm228_vm1, %v211_v9, 0.0  ;;  %v233_v18 = vsel %vm229_vm2, %v212_v10, 0.0  ;;  %v234_v19 = vsel %vm230_vm3, %v213_v11, 0.0  ;;  %p573_p2 = pneg %p572_p4 }
  0x69   : > { %v236_v20 = vadd.f32 %v232_v17, %v231_v15  ;;  %v249_v21 = vmul.f32 %v232_v17, %v232_v17  ;;  %v250_v22 = vmul.f32 %v233_v18, %v233_v18  ;;  %v251_v24 = vmul.f32 %v234_v19, %v234_v19  ;;  %p579_p6 = por %p578_p5, %p577_p3 }
  0x6b   : > { %v237_v23 = vadd.f32 %v236_v20, %v233_v18  ;;  %v252_v25 = vadd.f32 %v249_v21, %v248_v16  ;;  %p580_p9 = pnand %p579_p6, %p573_p2 }
  0x6d   : > { %v238_v26 = vadd.f32 %v237_v23, %v234_v19  ;;  %v253_v27 = vadd.f32 %v252_v25, %v250_v22 }
  0x6f   : > { %v239_v28 = vrot.slane %v238_v26, 4  ;;  %v254_v29 = vadd.f32 %v253_v27, %v251_v24 }
  0x71   : > { %v240_v30 = vadd.f32 %v239_v28, %v238_v26  ;;  %v255_v31 = vrot.slane %v254_v29, 4 }
  0x73   : > { %v241_v32 = vrot.slane %v240_v30, 2  ;;  %v256_v33 = vadd.f32 %v255_v31, %v254_v29 }
  0x75   : > { %v242_v34 = vadd.f32 %v241_v32, %v240_v30  ;;  %v257_v35 = vrot.slane %v256_v33, 2 }
  0x77   : > { %v243_v36 = vrot.slane %v242_v34, 1  ;;  %v258_v37 = vadd.f32 %v257_v35, %v256_v33 }
  0x79   : > { %v244_v39 = vadd.f32 %v243_v36, %v242_v34  ;;  %v259_v40 = vrot.slane %v258_v37, 1 }
  0x7b   : > { %v245_v42 = vadd.f32 %v244_v39, %v235_v38  ;;  %v260_v43 = vadd.f32 %v259_v40, %v258_v37 }
  0x7d   : > { %246 = vst [vmem:[%s908_s24] sm:$0x1] %v245_v42  ;;  %v261_v44 = vadd.f32 %v260_v43, %v247_v41 }
  0x7e   : > { %583 = shalt.err (!%p580_p9)
}
  0x7f   : > { %s584_s24 = scalar_lea.hbm %s925_s25, 128  ;;  %s588_s16 = scalar_lea.hbm %s1020_s1, 256 }
  0x80   : > { %p585_p10 = scmp.ne.s32.totalorder %s925_s25, %s584_s24  ;;  %p589_p13 = scmp.lt.u32.totalorder %s925_s25, %s1020_s1 }
  0x81   : > { %p590_p0 = scmp.lt.u32.totalorder %s588_s16, %s584_s24  ;;  %p592_p7 = scmp.lt.u32.totalorder %s584_s24, %s925_s25 }
  0x82   : > { %p586_p11 = pnand %p585_p10, %p840_p12 }
  0x83   : > { %p591_p1 = por %p590_p0, %p589_p13 }
  0x84   : > { %p587_p8 = pneg %p586_p11 }
  0x85   : > { %p593_p4 = por %p592_p7, %p591_p1 }
  0x87   : > { %p594_p2 = pnand %p593_p4, %p587_p8 }
  0x89   : > { %597 = shalt.err (!%p594_p2)
}
  0x8a   : > { %439 = dma.vmem_to_hbm [thread:$0]  (%p840_p12), %s927_s22, 128, %s925_s25, %s264_s3   ;;  %262 = vst [vmem:[%s910_s20] sm:$0x1] %v261_v44 }
  0x8b   : > { %s269_s28 = scalar_lea.sflag [#allocation7], %s905_s30  ;;  %s598_s5 = scalar_lea.vmem %s935_s26, 128 }
  0x8c   : > { %p599_p3 = scmp.ne.s32.totalorder %s935_s26, %s598_s5  ;;  %s731_s29 = smov [#allocation6]  }
  0x8d   : > { %s602_s24 = sshll.u32 %s731_s29, 4  ;;  %s603_s24 = int_to_ptr.vmem [resolvable:$false] %s602_s24 }
  0x8e   : > { %p600_p5 = pnand %p599_p3, %p840_p12  ;;  %s604_s15 = scalar_lea.vmem %s603_s24, 256 }
  0x8f   : > { %p605_p9 = scmp.lt.s32.totalorder %s935_s26, %s603_s24  ;;  %p606_p10 = scmp.lt.s32.totalorder %s604_s15, %s598_s5 }
  0x90   : > { %p601_p6 = pneg %p600_p5 }
  0x91   : > { %p607_p11 = por %p606_p10, %p605_p9 }
  0x93   : > { %p608_p8 = pnand %p607_p11, %p601_p6 }
  0x95   : > { %611 = shalt.err (!%p608_p8)
}
  0x96   : > { %s612_s30 = scalar_lea.hbm %s933_s4, 128  ;;  %s616_s25 = scalar_lea.hbm %s1021_s2, 256 }
  0x97   : > { %p613_p13 = scmp.ne.s32.totalorder %s933_s4, %s612_s30  ;;  %p617_p7 = scmp.lt.u32.totalorder %s933_s4, %s1021_s2 }
  0x98   : > { %p618_p4 = scmp.lt.u32.totalorder %s616_s25, %s612_s30  ;;  %p620_p3 = scmp.lt.u32.totalorder %s612_s30, %s933_s4 }
  0x99   : > { %p614_p0 = pnand %p613_p13, %p840_p12 }
  0x9a   : > { %p619_p2 = por %p618_p4, %p617_p7 }
  0x9b   : > { %p615_p1 = pneg %p614_p0 }
  0x9c   : > { %p621_p5 = por %p620_p3, %p619_p2 }
  0x9e   : > { %p622_p6 = pnand %p621_p5, %p615_p1 }
  0xa0   : > { %625 = shalt.err (!%p622_p6)
}
  0xa1   : > { %440 = dma.vmem_to_hbm [thread:$0]  (%p840_p12), %s935_s26, 128, %s933_s4, %s269_s28  }
  0xa2 PF: > { %p450_p9 = scmp.ge.s32.totalorder %s724_s19, 2  ;;  %s307_s16 = sand.u32 1, %s684_s9  }
  0xa3   : > { %p1030_p10 = scmp.ne.s32.totalorder %s1029_s12, 0  ;;  %s308_s23 = scalar_lea.sflag [#allocation4], %s307_s16 }
  0xa5   : > { %p444_p11 = pnand %p450_p9, %p1030_p10 }
  0xa7   : > { %675 = dma.done.wait (!%p444_p11), %s308_s23, 128  }
  0xa8   : > { %677 = vsyncadd (!%p444_p11), %s308_s23, 4294967168  ;;  %s317_s27 = scalar_lea.sflag [#allocation7], %s307_s16 }
  0xa9   : > { %679 = dma.done.wait (!%p444_p11), %s317_s27, 128  }
  0xaa   : > { %681 = vsyncadd (!%p444_p11), %s317_s27, 4294967168  ;;  %s22_s19 = sadd.s32 1, %s724_s19   ;;  %s1031_s8 = sld [smem:[#allocation11_spill]] }
  0xab   : > { %p19_p8 = scmp.ge.s32.totalorder %s22_s19, 6   ;;  %s1032_s26 = sld [smem:[#allocation12_spill]] }
  0xac   : > { %s1033_s9 = smov %s688_s10  ;;  %s1034_s10 = smov %s692_s11 }
  0xad   : > { %s1035_s11 = smov %s835_s6  ;;  %s1036_s12 = smov %s700_s13 }
  0xae   : > { %s1037_s13 = smov %s704_s14  ;;  %s1038_s14 = smov %s838_s7 }
  0xaf   : > { %s1039_s15 = smov %s716_s17  ;;  %s1040_s16 = smov %s720_s18 }
  0xb0   : > { %s1041_s17 = smov %s1031_s8  ;;  %21 = sbr.rel (!%p19_p8) target bundleno = 11 (0xb), region = 90 }
  0xb1   : > { %s1042_s18 = smov %s1032_s26 }
  0xb7   :  { %322 = vsyncpa [#allocation3], 1 }
  0xb8   :  { %324 = vsyncpa [#allocation3 + $0x1], 1 }
  0xb9   :  { %325 = vsyncpa [#allocation4], 1 }
  0xba   :  { %327 = vsyncpa [#allocation4 + $0x1], 1 }
  0xbb   :  { %328 = vsyncpa [#allocation7], 1 }
  0xbc   :  { %330 = vsyncpa [#allocation7 + $0x1], 1 }

</bundles_post_ra>
